<compile_context>
chip_gen: v6e
topology: v6e:2x2x1
jax: 0.10.0
libtpu: 0.0.40
codegen_flags: <defaults>
</compile_context>

<pallas_src>
import functools

import jax
import jax.numpy as jnp
from jax.experimental import pallas as pl
from jax.experimental.pallas import tpu as pltpu

_LANE = 128

# Lane-aligned tensors at or below this total size run as one full-extent
# block (per-step overhead dominates DMA at these sizes; pipelining is moot).
_SINGLE_BLOCK_BYTES = 256 * 1024
# Unaligned tensors at or below this size run as one (1, n) block.  The
# sublane dim pads 1->8 in VMEM, so keep this small:
# 64 KiB data -> ~2 MiB VMEM including double-buffered in+out.
_SMALL_UNALIGNED_BYTES = 64 * 1024
# When a tensor is big enough to tile, aim for at least this many grid steps
# so both v7x TensorCores get work and DMA/compute overlap kicks in.
_MIN_GRID_STEPS = 4


def _round_up(a, b):
    return (a + b - 1) // b * b


def _sublane_min(dtype) -> int:
    """Minimum second-to-last tile dim for this dtype: 8 (f32), 16 (bf16), 32 (i8)."""
    return max(8, 32 // jnp.dtype(dtype).itemsize)


def _block_config():
    """Generation-aware (block_bytes, vmem_limit_bytes).

    Footprint per grid step = block x 2 buffers x (in + out) = 4 x block,
    kept well under the explicit vmem_limit_bytes, which itself leaves
    headroom under physical VMEM (128 MiB v5e/v6e, 64 MiB v7x).
    """
    block, limit = 4 << 20, 40 << 20  # conservative fallback, safe everywhere
    try:
        phys = int(pltpu.get_tpu_info().vmem_capacity_bytes)
        if phys >= (96 << 20):        # v5e / v6e: 128 MiB physical VMEM
            block, limit = 8 << 20, 64 << 20
        else:                          # v7x: 64 MiB physical VMEM
            block, limit = 6 << 20, 48 << 20
    except Exception:
        pass
    return block, limit


def _int_pow_mul_count(k: int) -> int:
    """Number of multiplies used by exponentiation-by-squaring for |k|."""
    k = abs(int(k))
    if k <= 1:
        return 0
    return (k.bit_length() - 1) + (bin(k).count("1") - 1)


def _pow_static_f32(x, exp):
    """Elementwise x**exp in float32 with exp a static Python scalar.

    torch.pow(Tensor, Scalar) semantics:
      * integer exp    -> exact sign handling for negative bases
                          (exponentiation by squaring, reciprocal if exp < 0)
      * fractional exp -> pow in f32; negative bases yield NaN (as torch)
    """
    exp = float(exp)
    if exp == 0.0:  # not reached via wrapper (short-circuited), kept for safety
        return jnp.ones_like(x)
    if exp.is_integer():
        n = int(abs(exp))
        result = None
        base = x
        while n:
            if n & 1:
                result = base if result is None else result * base
            base = base * base
            n >>= 1
        if exp < 0.0:
            # Exact reciprocal (full-precision divide) for torch parity; the
            # kernel is HBM-bound so the extra VPU cost is hidden under DMA.
            result = pl.reciprocal(result, approx=False)
        return result
    # Fractional exponent: EUP-bound (log + exp); computed in f32 for accuracy.
    return jnp.power(x, jnp.float32(exp))


def _pow_kernel(x_ref, o_ref, *, exp):
    # f32 opmath for parity with torch (which upcasts bf16 to f32 for pow).
    # TODO(synk): on v6e/v7x a bf16-native jnp.power would halve EUP pressure
    # for bf16 fractional exponents, at the cost of torch-parity precision.
    x = x_ref[...].astype(jnp.float32)
    o_ref[...] = _pow_static_f32(x, exp).astype(o_ref.dtype)


def _run_pow_2d(x2d, exp, tile_rows, tile_cols, vmem_limit, donate=False):
    rows, cols = x2d.shape
    grid = (pl.cdiv(rows, tile_rows),)
    kernel = functools.partial(_pow_kernel, exp=exp)

    n = rows * cols
    itemsize = jnp.dtype(x2d.dtype).itemsize
    exp_f = float(exp)
    if exp_f.is_integer():
        flops = n * max(1, _int_pow_mul_count(int(exp_f)))
        transcendentals = n if exp_f < 0.0 else 0   # reciprocal
    else:
        flops = n
        transcendentals = 2 * n                     # log + exp

    return pl.pallas_call(
        kernel,
        out_shape=jax.ShapeDtypeStruct((rows, cols), x2d.dtype),
        grid_spec=pltpu.PrefetchScalarGridSpec(
            num_scalar_prefetch=0,
            grid=grid,
            in_specs=[pl.BlockSpec((tile_rows, tile_cols), lambda i: (i, 0))],
            out_specs=pl.BlockSpec((tile_rows, tile_cols), lambda i: (i, 0)),
        ),
        compiler_params=pltpu.CompilerParams(
            dimension_semantics=("parallel",),
            vmem_limit_bytes=vmem_limit,
        ),
        cost_estimate=pl.CostEstimate(
            flops=flops,
            transcendentals=transcendentals,
            bytes_accessed=2 * n * itemsize,
        ),
        input_output_aliases=({0: 0} if donate else {}),
    )(x2d)


def pow_tensor_scalar(x: jax.Array, exp, *, donate: bool = False) -> jax.Array:
    """y = x ** exp (exp static Python scalar), computed in a Pallas TPU kernel.

    Set donate=True only if the caller actually donates x (e.g. jit
    donate_argnums); then the kernel writes the output in-place over x.
    """
    exp = float(exp)
    orig_shape = x.shape
    dtype = x.dtype
    n = x.size

    if n == 0:
        return x
    # Trivial exponents: avoid the kernel (and for exp==0, reading x) entirely.
    if exp == 1.0:
        return x
    if exp == 0.0:
        return jnp.ones_like(x)

    itemsize = jnp.dtype(dtype).itemsize
    sub_min = _sublane_min(dtype)
    block_bytes, vmem_limit = _block_config()
    max_tile_rows = max(
        sub_min,
        (block_bytes // (_LANE * itemsize)) // sub_min * sub_min,
    )

    def _tile_rows_for(rows):
        # >= _MIN_GRID_STEPS blocks (megacore + DMA/compute overlap), capped
        # at the generation-aware block size; sublane-multiple so every block
        # except the masked ragged last one is tile-aligned.
        want = _round_up(-(-rows // _MIN_GRID_STEPS), sub_min)
        return max(sub_min, min(max_tile_rows, want))

    if n % _LANE == 0:
        # Lane-aligned: (rows, 128) view, no host-side pad or tail slice.
        rows = n // _LANE
        x2d = x.reshape(rows, _LANE)
        if n * itemsize <= _SINGLE_BLOCK_BYTES:
            tile_rows = rows  # tiny tensor: one full-extent block (always legal)
        else:
            tile_rows = _tile_rows_for(rows)
        out2d = _run_pow_2d(x2d, exp, tile_rows, _LANE, vmem_limit, donate)
        return out2d.reshape(orig_shape)

    if n * itemsize <= _SMALL_UNALIGNED_BYTES:
        # Genuinely small unaligned element count: one full-array (1, n) block.
        out2d = _run_pow_2d(x.reshape(1, n), exp, 1, n, vmem_limit, donate)
        return out2d.reshape(orig_shape)

    # Rare fallback: large tensor whose element count is not a multiple of 128.
    # Run the tiled kernel on the lane-aligned prefix and a tiny (1, rem<=127)
    # block on the tail; no padded input copy.
    flat = x.reshape(-1)
    n_aligned = (n // _LANE) * _LANE
    rem = n - n_aligned
    rows = n_aligned // _LANE
    y_prefix = _run_pow_2d(
        flat[:n_aligned].reshape(rows, _LANE), exp,
        _tile_rows_for(rows), _LANE, vmem_limit)
    y_tail = _run_pow_2d(flat[n_aligned:].reshape(1, rem), exp, 1, rem, vmem_limit)
    # TODO(synk): the concatenate below is one residual output stitch copy;
    # avoiding it would need a manual-DMA (memory_space=pl.ANY) kernel over the
    # ragged flat array, not worth it for this rarely-hit fallback.
    return jnp.concatenate(
        [y_prefix.reshape(-1), y_tail.reshape(-1)]).reshape(orig_shape)


if __name__ == "__main__":
    key = jax.random.PRNGKey(0)
    keys = jax.random.split(key, 10)

    # Test cases mirroring the PyTorch module's test_data, plus lane-aligned
    # NCHW cases exercising the single-block and multi-block (rows, 128) paths
    # and the large-unaligned prefix+tail fallback.
    cases = {
        "exp_minus_three": (jax.random.normal(keys[0], (10, 5), jnp.float32), -3.0),
        "exp_minus_one": (jax.random.normal(keys[1], (42,), jnp.float32), -1.0),
        "exp_zero": (jax.random.normal(keys[2], (1, 2, 3, 7), jnp.float32), 0.0),
        "exp_one": (jax.random.normal(keys[3], (1, 4, 6, 2), jnp.float32), 1.0),
        "exp_two": (jax.random.normal(keys[4], (1, 2, 3, 6), jnp.float32), 2.0),
        "non_neg_base_exp_pos_decimal": (
            jnp.abs(jax.random.normal(keys[5], (1, 2, 3, 6), jnp.float32)),
            6.789,
        ),
        "neg_base_exp_pos_integer": (
            -jnp.abs(jax.random.normal(keys[6], (1, 2, 3, 6), jnp.float32)) - 10.0,
            3,
        ),
        "exp_two_nchw_aligned_small": (
            jax.random.normal(keys[7], (2, 4, 16, 16), jnp.float32),
            2.0,
        ),
        "exp_minus_three_nchw_aligned_tiled": (
            jax.random.normal(keys[8], (8, 16, 32, 32), jnp.float32),
            -3.0,
        ),
        "exp_two_large_unaligned_fallback": (
            jax.random.normal(keys[9], (16411,), jnp.float32),
            2.0,
        ),
    }

    ok = True
    for name, (x, exp) in cases.items():
        y = jax.block_until_ready(pow_tensor_scalar(x, exp))
        # Pure-JAX reference (torch.pow semantics for a static scalar exponent).
        if float(exp).is_integer():
            ref = jnp.power(x, jnp.asarray(int(exp), jnp.int32)).astype(x.dtype)
        else:
            ref = jnp.power(x, jnp.float32(exp))
        if y.shape != x.shape or y.dtype != x.dtype:
            ok = False
            print(f"SHAPE/DTYPE MISMATCH in case {name}")
        elif not jnp.allclose(y, ref, rtol=1e-4, atol=1e-5, equal_nan=True):
            ok = False
            print(f"MISMATCH in case {name}")

    if ok:
        print("KERNEL_OK")
</pallas_src>

<mosaic_0001>
module attributes {stable_mosaic.version = 11 : i64} {
  func.func @_pow_kernel(%arg0: i32, %arg1: memref<1x50xf32, #tpu.memory_space<vmem>>, %arg2: memref<1x50xf32, #tpu.memory_space<vmem>>) attributes {dimension_semantics = [#tpu.dimension_semantics<parallel>], iteration_bounds = array<i64: 1>, scalar_prefetch = 0 : i64, scratch_operands = 0 : i64, tpu.core_type = #tpu.core_type<tc>, window_params = [{transform_indices = @transform_0, window_bounds = array<i64: 1, 50>}, {transform_indices = @transform_1, window_bounds = array<i64: 1, 50>}]} {
    %c0 = arith.constant 0 : index
    %c0_0 = arith.constant 0 : index
    %0 = vector.load %arg1[%c0, %c0_0] : memref<1x50xf32, #tpu.memory_space<vmem>>, vector<1x50xf32>
    %1 = arith.mulf %0, %0 : vector<1x50xf32>
    %2 = arith.mulf %0, %1 : vector<1x50xf32>
    %3 = tpu.reciprocal %2 : vector<1x50xf32> -> vector<1x50xf32>
    %c0_1 = arith.constant 0 : index
    %c0_2 = arith.constant 0 : index
    %4 = vector.load %arg2[%c0_1, %c0_2] : memref<1x50xf32, #tpu.memory_space<vmem>>, vector<1x50xf32>
    tpu.vector_store %arg2[%c0_1, %c0_2], %3 {strides = array<i32>} : memref<1x50xf32, #tpu.memory_space<vmem>>, vector<1x50xf32>,
    return
  }
  func.func @transform_0(%arg0: i32) -> (i32, i32) {
    %c0_i32 = arith.constant 0 : i32
    %c0_i32_0 = arith.constant 0 : i32
    return %arg0, %c0_i32 : i32, i32
  }
  func.func @transform_1(%arg0: i32) -> (i32, i32) {
    %c0_i32 = arith.constant 0 : i32
    %c0_i32_0 = arith.constant 0 : i32
    return %arg0, %c0_i32 : i32, i32
  }
}

</mosaic_0001>

<bundles_post_ra>
// kernel: tpu_custom_call.1
= control target key start
LH: loop header
LB: loop body
LE: loop exit
PB: predicated region body
PF: predicated region fallthrough
CT: control target
= control target key end

     0   :  { %6 = vsyncpa [#allocation3], 0  ;;  %s108_s0 = inlined_call_operand.hbm [shape: f32[1,50], index: 0, kind: input, shape index: {}]   ;;  %s109_s1 = inlined_call_operand.hbm [shape: f32[1,50], index: 1, kind: output, shape index: {}]  }
   0x1   :  { %7 = vsyncpa [#allocation4], 0  ;;  %s90_s6 = smov [#allocation2]  }
   0x2   :  { %s14_s7 = sshll.u32 %s90_s6, 4  ;;  %s15_s7 = int_to_ptr.vmem [resolvable:$true] %s14_s7 }
   0x3   :  { %s54_s8 = scalar_lea.vmem %s15_s7, 16  ;;  %s58_s9 = scalar_lea.vmem %s15_s7, 32 }
   0x4   :  { %p55_p0 = scmp.ne.s32.totalorder %s15_s7, %s54_s8  ;;  %p59_p1 = scmp.lt.s32.totalorder %s15_s7, %s15_s7 }
   0x5   :  { %p60_p2 = scmp.lt.s32.totalorder %s58_s9, %s54_s8 }
   0x7   :  { %p61_p3 = por %p60_p2, %p59_p1 }
   0x9   :  { %p62_p4 = pnand %p61_p3, %p55_p0 }
   0xb   :  { %65 = shalt.err (!%p62_p4)
}
   0xc   :  { %17 = dma.hbm_to_vmem [thread:$0]  %s108_s0, 16, %s15_s7, [#allocation3]  }
   0xd   :  { %86 = dma.done.wait [#allocation3], 16  }
   0xe   :  { %87 = vsyncadd [#allocation3], 4294967280  ;;  %v21_v0 = vld [vmem:[#allocation2] sm:$0x1]  ;;  %s91_s12 = smov [#allocation5]   ;;  %vm25_vm0 = vcmask 401408  }
   0xf   :  { %v22_v1 = vmul.f32 %v21_v0, %v21_v0  ;;  %s33_s13 = sshll.u32 %s91_s12, 4  ;;  %s34_s13 = int_to_ptr.vmem [resolvable:$true] %s33_s13 }
  0x10   :  { %s66_s14 = scalar_lea.vmem %s34_s13, 16  ;;  %s70_s15 = scalar_lea.vmem %s34_s13, 32 }
  0x11   :  { %v23_v2 = vmul.f32 %v22_v1, %v21_v0  ;;  %p67_p5 = scmp.ne.s32.totalorder %s34_s13, %s66_s14  ;;  %p71_p6 = scmp.lt.s32.totalorder %s34_s13, %s34_s13 }
  0x12   :  { %p72_p7 = scmp.lt.s32.totalorder %s70_s15, %s66_s14 }
  0x13   :  { %44 = vrcp.f32 %v23_v2 }
  0x14   :  { %p73_p8 = por %p72_p7, %p71_p6 }
  0x16   :  { %p74_p9 = pnand %p73_p8, %p67_p5 }
  0x20   :  { %v45_v3 = vpop.eup %44 }
  0x21   :  { %26 = vst.msk [vmem:[#allocation5] sm:$0x1] %vm25_vm0, %v45_v3 }
  0x22   :  { %77 = shalt.err (!%p74_p9)
}
  0x23   :  { %36 = dma.vmem_to_hbm [thread:$0]  %s34_s13, 16, %s109_s1, [#allocation4]  }
  0x24   :  { %88 = dma.done.wait [#allocation4], 16  }
  0x25   :  { %89 = vsyncadd [#allocation4], 4294967280 }
  0x26   :  { %40 = vsyncpa [#allocation3], 1 }
  0x27   :  { %41 = vsyncpa [#allocation4], 1 }

</bundles_post_ra>
